<compile_context>
chip_gen: v7x
topology: tpu7x:2x2x1
jax: 0.10.0
libtpu: 0.0.40
codegen_flags: <defaults>
</compile_context>

<pallas_src>
import functools

import jax
import jax.numpy as jnp
from jax import lax
from jax.experimental import pallas as pl
from jax.experimental.pallas import tpu as pltpu

_LANE = 128


def _round_up(x, m):
    return ((x + m - 1) // m) * m


def _pick_tile(n, prefs=(512, 256, 128)):
    for t in prefs:
        if n % t == 0:
            return t
    return n


def _vmem_capacity_bytes():
    try:
        return int(pltpu.get_tpu_info().vmem_capacity_bytes)
    except Exception:
        return 64 * 1024 * 1024  # conservative fallback (v7x per-core VMEM)


# ----------------------------- Pallas kernels ------------------------------

def _mlp_kernel(*refs, num_layers):
    """Fused MLP on one row-tile of nodes.

    refs = (x_ref, w1_ref, b1_ref, ..., wL_ref, bL_ref, o_ref).  Weights are
    pre-transposed to [in, out] and stored in bf16; matmuls accumulate in f32,
    biases are added in f32, intermediate activations are re-cast to bf16.
    ReLU on every layer except the last.
    """
    x_ref = refs[0]
    o_ref = refs[-1]
    h = x_ref[...]                                    # bf16 activations
    for i in range(num_layers):
        w = refs[1 + 2 * i][...]                      # bf16 [in, out]
        b = refs[2 + 2 * i][...]                      # f32  [1, out]
        h = jnp.dot(h, w, preferred_element_type=jnp.float32) + b
        if i < num_layers - 1:
            h = jnp.maximum(h, 0.0).astype(jnp.bfloat16)
    o_ref[...] = h.astype(o_ref.dtype)


def _appnp_resident_kernel(a_hbm_ref, h0_ref, s_in_ref, s_out_ref, o_ref,
                           a_vmem_ref, a_sem, *, alpha):
    """One APPNP power-iteration step (grid axis 0 = step index), resident A.

    A lives in HBM (memory_space=ANY) and is copied once at step 0 into a
    single-buffered VMEM scratch.  h0 / s vectors are VMEM-resident (constant
    index_maps); the OUTPUT block (constant index_map) is the h_t carry.
      h_{t+1} = s_out * (A @ (s_in * h_t)) + alpha * h_0,   s_out = (1-a) s_in
    """
    t = pl.program_id(0)

    @pl.when(t == 0)
    def _():
        cp = pltpu.make_async_copy(a_hbm_ref, a_vmem_ref, a_sem)
        cp.start()
        cp.wait()
        o_ref[...] = h0_ref[...]

    sh = (s_in_ref[...] * o_ref[...]).astype(a_vmem_ref.dtype)     # bf16 RHS
    ah = jnp.dot(a_vmem_ref[...], sh, preferred_element_type=jnp.float32)
    # alpha*h0 kept inline (one broadcast mul per step) to avoid an extra
    # [Np,Cp] f32 scratch; the step is MXU-bound anyway.
    o_ref[...] = s_out_ref[...] * ah + alpha * h0_ref[...]


def _appnp_tiled_step_kernel(a_ref, h_ref, s_in_ref, s_out_ref, ah0_ref,
                             o_ref, acc_ref):
    """One APPNP step as a blocked matmul: grid = (row tiles, reduction tiles)."""
    kk = pl.program_id(1)

    @pl.when(kk == 0)
    def _():
        acc_ref[...] = jnp.zeros_like(acc_ref)

    sh = (s_in_ref[...] * h_ref[...]).astype(a_ref.dtype)
    acc_ref[...] += jnp.dot(a_ref[...], sh, preferred_element_type=jnp.float32)

    @pl.when(kk == pl.num_programs(1) - 1)
    def _():
        o_ref[...] = s_out_ref[...] * acc_ref[...] + ah0_ref[...]


# ------------------------------ JAX wrappers --------------------------------

def pallas_mlp(x, layers, *, tile_m=512):
    """x: [Np, Fp] bf16; layers: list of (W bf16 [in_p,out_p], b f32 [1,out_p])."""
    np_, fp = x.shape
    cp = layers[-1][0].shape[1]
    num_layers = len(layers)
    tm = _pick_tile(np_, (tile_m, 256, 128))          # tm | np_ (np_ is 128-padded)

    in_specs = [pl.BlockSpec((tm, fp), lambda i: (i, 0))]
    args = [x]
    for (w, b) in layers:
        in_specs.append(pl.BlockSpec(w.shape, lambda i: (0, 0)))   # weights resident
        in_specs.append(pl.BlockSpec(b.shape, lambda i: (0, 0)))
        args.extend([w, b])

    return pl.pallas_call(
        functools.partial(_mlp_kernel, num_layers=num_layers),
        out_shape=jax.ShapeDtypeStruct((np_, cp), jnp.float32),
        grid=(np_ // tm,),
        in_specs=in_specs,
        out_specs=pl.BlockSpec((tm, cp), lambda i: (i, 0)),
        compiler_params=pltpu.CompilerParams(dimension_semantics=("parallel",)),
    )(*args)


def _appnp_tiled_step(adj_bf16, h, s_in, s_out, ah0, *, tile, vmem_limit):
    np_, cp = h.shape
    tm = tk = tile
    return pl.pallas_call(
        _appnp_tiled_step_kernel,
        out_shape=jax.ShapeDtypeStruct((np_, cp), jnp.float32),
        grid=(np_ // tm, np_ // tk),
        in_specs=[
            pl.BlockSpec((tm, tk), lambda i, k: (i, k)),    # A tile
            pl.BlockSpec((tk, cp), lambda i, k: (k, 0)),    # h_t rows (reduction side)
            pl.BlockSpec((tk, 1), lambda i, k: (k, 0)),     # D^-1/2 (reduction side)
            pl.BlockSpec((tm, 1), lambda i, k: (i, 0)),     # (1-alpha) D^-1/2 (row side)
            pl.BlockSpec((tm, cp), lambda i, k: (i, 0)),    # alpha * h0 (row side)
        ],
        out_specs=pl.BlockSpec((tm, cp), lambda i, k: (i, 0)),
        scratch_shapes=[pltpu.VMEM((tm, cp), jnp.float32)],
        compiler_params=pltpu.CompilerParams(
            dimension_semantics=("parallel", "arbitrary"),
            vmem_limit_bytes=vmem_limit,
        ),
    )(adj_bf16, h, s_in, s_out, ah0)


def pallas_appnp(adj_bf16, h0, s, *, alpha, k, force_tiled=False, tile=None):
    """adj_bf16: [Np,Np] 0/1 adjacency (bf16), h0: [Np,Cp] f32, s: [Np,1] = D^-1/2."""
    np_, cp = h0.shape
    if k <= 0:
        return h0

    alpha = float(alpha)
    s_in = s
    s_out = (1.0 - alpha) * s

    # Per-chip VMEM budget (85% of physical), used both as the compiler limit
    # and to choose resident-A vs tiled fallback.
    budget = int(0.85 * _vmem_capacity_bytes())
    need = (adj_bf16.size * adj_bf16.dtype.itemsize        # A: single-buffered scratch
            + 4 * h0.size * 4                              # h0 (x2 pipelined) + out
            + 8 * np_ * 4                                  # s vectors
            + (2 << 20))                                   # compiler headroom
    use_resident = (not force_tiled) and need <= budget

    if use_resident:
        return pl.pallas_call(
            functools.partial(_appnp_resident_kernel, alpha=alpha),
            out_shape=jax.ShapeDtypeStruct((np_, cp), jnp.float32),
            grid=(k,),
            in_specs=[
                pl.BlockSpec(memory_space=pl.ANY),            # A stays in HBM; manual DMA
                pl.BlockSpec((np_, cp), lambda t: (0, 0)),    # h0: resident
                pl.BlockSpec((np_, 1), lambda t: (0, 0)),     # D^-1/2
                pl.BlockSpec((np_, 1), lambda t: (0, 0)),     # (1-alpha) D^-1/2
            ],
            out_specs=pl.BlockSpec((np_, cp), lambda t: (0, 0)),  # doubles as h_t carry
            scratch_shapes=[
                pltpu.VMEM((np_, np_), jnp.bfloat16),         # single-buffered resident A
                pltpu.SemaphoreType.DMA,
            ],
            compiler_params=pltpu.CompilerParams(
                dimension_semantics=("arbitrary",),           # k steps are sequential
                vmem_limit_bytes=budget,
            ),
        )(adj_bf16, h0, s_in, s_out)

    # ---- tiled fallback: A streamed from HBM, one pallas_call per step ------
    if tile is None:
        tile = _pick_tile(np_, (512, 256, 128))
    ah0 = alpha * h0
    h = h0
    for _ in range(k):
        h = _appnp_tiled_step(adj_bf16, h, s_in, s_out, ah0,
                              tile=tile, vmem_limit=budget)
    return h


def appnp2_forward(features, adj, params, *, alpha, k,
                   force_tiled=False, tiled_tile=None):
    """APPNP2.forward: fused MLP + APPNP propagation (eval mode, dropout = identity)."""
    n, f = features.shape
    layers = params["layers"]
    n_classes = layers[-1][0].shape[1]

    # --- pad everything to lane-dense (multiples of 128) shapes --------------
    np_ = _round_up(n, _LANE)
    fp = _round_up(f, _LANE)
    x = jnp.pad(features.astype(jnp.bfloat16), ((0, np_ - n), (0, fp - f)))

    padded_layers = []
    for (w_t, b) in layers:
        di, do = w_t.shape
        dip, dop = _round_up(di, _LANE), _round_up(do, _LANE)
        wp = jnp.pad(w_t, ((0, dip - di), (0, dop - do))).astype(jnp.bfloat16)
        bp = jnp.pad(b, ((0, 0), (0, dop - do)))
        padded_layers.append((wp, bp))

    # --- fused MLP ------------------------------------------------------------
    h0 = pallas_mlp(x, padded_layers)                       # [Np, Cp] f32

    # --- APPNP propagation -----------------------------------------------------
    # Degree from the unpadded 0/1 adjacency; A cast to bf16 (exact for 0/1)
    # before padding.  Phantom padded nodes have zero rows/cols so they never
    # touch real nodes; their s is set to 1 (unused).
    deg = jnp.maximum(jnp.sum(adj, axis=1), 1.0)
    s = jnp.pad(lax.rsqrt(deg), (0, np_ - n), constant_values=1.0)[:, None]
    adj_bf16 = jnp.pad(adj.astype(jnp.bfloat16), ((0, np_ - n), (0, np_ - n)))

    out = pallas_appnp(adj_bf16, h0, s, alpha=alpha, k=k,
                       force_tiled=force_tiled, tile=tiled_tile)   # [Np, Cp]
    return out[:n, :n_classes]


# ------------------------------ Param init -----------------------------------

def init_params(key, in_feats, hiddens, n_classes):
    dims = [in_feats] + list(hiddens) + [n_classes]
    layers = []
    for i in range(len(dims) - 1):
        fan_in, fan_out = dims[i], dims[i + 1]
        key, kw, kb = jax.random.split(key, 3)
        bound = 1.0 / jnp.sqrt(float(fan_in))
        # nn.Linear stores weight [out, in]; we keep it transposed [in, out].
        w_t = jax.random.uniform(kw, (fan_in, fan_out), jnp.float32, -bound, bound)
        b = jax.random.uniform(kb, (1, fan_out), jnp.float32, -bound, bound)
        layers.append((w_t, b))
    return {"layers": layers}


# --------------------------------- main --------------------------------------

if __name__ == "__main__":
    N = 200            # deliberately not a multiple of 128 to exercise padding
    IN_FEATS = 64
    HIDDENS = [32]
    N_CLASSES = 16
    ALPHA = 0.1
    K = 10

    key = jax.random.PRNGKey(0)
    k_feat, k_adj, k_param = jax.random.split(key, 3)

    features = jax.random.normal(k_feat, (N, IN_FEATS), jnp.float32)

    # random symmetric adjacency with self-loops
    a = (jax.random.uniform(k_adj, (N, N)) < 0.05).astype(jnp.float32)
    adj = jnp.clip(a + a.T + jnp.eye(N, dtype=jnp.float32), 0.0, 1.0)

    params = init_params(k_param, IN_FEATS, HIDDENS, N_CLASSES)

    # Fast path: VMEM-resident A, h_t carried in the output block.
    out = appnp2_forward(features, adj, params, alpha=ALPHA, k=K)
    out = jax.block_until_ready(out)
    assert out.shape == (N, N_CLASSES) and out.dtype == jnp.float32

    # Also exercise the tiled fallback (used when A doesn't fit VMEM) with a
    # small tile so both code paths are covered by this script.
    out_tiled = appnp2_forward(features, adj, params, alpha=ALPHA, k=K,
                               force_tiled=True, tiled_tile=128)
    out_tiled = jax.block_until_ready(out_tiled)
    assert out_tiled.shape == (N, N_CLASSES)

    # pure-JAX f32 reference sanity check (bf16 MLP / A@h give small, bounded error)
    def ref_forward(x, adj_, p):
        h = x
        for (w_t, b) in p["layers"][:-1]:
            h = jnp.maximum(h @ w_t + b, 0.0)
        w_t, b = p["layers"][-1]
        h = h @ w_t + b
        deg = jnp.maximum(jnp.sum(adj_, axis=1), 1.0)
        sc = lax.rsqrt(deg)[:, None]
        h0 = h
        for _ in range(K):
            h = (1.0 - ALPHA) * (sc * (adj_ @ (sc * h))) + ALPHA * h0
        return h

    ref = ref_forward(features, adj, params)
    err_resident = float(jnp.max(jnp.abs(out - ref)))
    err_tiled = float(jnp.max(jnp.abs(out_tiled - ref)))
    assert err_resident < 5e-2, f"resident path max abs err {err_resident}"
    assert err_tiled < 5e-2, f"tiled path max abs err {err_tiled}"

    print("KERNEL_OK")
</pallas_src>

<mosaic_0001>
module attributes {stable_mosaic.version = 11 : i64} {
  func.func @_mlp_kernel(%arg0: i32, %arg1: memref<256x128xbf16, #tpu.memory_space<vmem>>, %arg2: memref<128x128xbf16, #tpu.memory_space<vmem>>, %arg3: memref<1x128xf32, #tpu.memory_space<vmem>>, %arg4: memref<128x128xbf16, #tpu.memory_space<vmem>>, %arg5: memref<1x128xf32, #tpu.memory_space<vmem>>, %arg6: memref<256x128xf32, #tpu.memory_space<vmem>>) attributes {dimension_semantics = [#tpu.dimension_semantics<parallel>], iteration_bounds = array<i64: 1>, scalar_prefetch = 0 : i64, scratch_operands = 0 : i64, tpu.core_type = #tpu.core_type<tc>, window_params = [{transform_indices = @transform_0, window_bounds = array<i64: 256, 128>}, {pipeline_mode = #tpu.pipeline_mode<synchronous>, transform_indices = @transform_1, window_bounds = array<i64: 128, 128>}, {pipeline_mode = #tpu.pipeline_mode<synchronous>, transform_indices = @transform_2, window_bounds = array<i64: 1, 128>}, {pipeline_mode = #tpu.pipeline_mode<synchronous>, transform_indices = @transform_3, window_bounds = array<i64: 128, 128>}, {pipeline_mode = #tpu.pipeline_mode<synchronous>, transform_indices = @transform_4, window_bounds = array<i64: 1, 128>}, {transform_indices = @transform_5, window_bounds = array<i64: 256, 128>}]} {
    %c0 = arith.constant 0 : index
    %c0_0 = arith.constant 0 : index
    %0 = vector.load %arg1[%c0, %c0_0] : memref<256x128xbf16, #tpu.memory_space<vmem>>, vector<256x128xbf16>
    %c0_1 = arith.constant 0 : index
    %c0_2 = arith.constant 0 : index
    %1 = vector.load %arg2[%c0_1, %c0_2] : memref<128x128xbf16, #tpu.memory_space<vmem>>, vector<128x128xbf16>
    %c0_3 = arith.constant 0 : index
    %c0_4 = arith.constant 0 : index
    %2 = vector.load %arg3[%c0_3, %c0_4] : memref<1x128xf32, #tpu.memory_space<vmem>>, vector<1x128xf32>
    %cst = arith.constant dense<0.000000e+00> : vector<256x128xf32>
    %3 = tpu.matmul %0, %1, %cst {dimension_numbers = #tpu.dot_dimension_numbers<[1], [0], [0], [1], [0, 0, 1, 1], [], []>} : vector<256x128xbf16>, vector<128x128xbf16>, vector<256x128xf32> -> vector<256x128xf32>
    %4 = vector.broadcast %2 : vector<1x128xf32> to vector<256x128xf32>
    %5 = arith.addf %3, %4 : vector<256x128xf32>
    %cst_5 = arith.constant 0.000000e+00 : f32
    %6 = vector.broadcast %cst_5 : f32 to vector<256x128xf32>
    %7 = arith.maximumf %5, %6 : vector<256x128xf32>
    %8 = arith.truncf %7 : vector<256x128xf32> to vector<256x128xbf16>
    %c0_6 = arith.constant 0 : index
    %c0_7 = arith.constant 0 : index
    %9 = vector.load %arg4[%c0_6, %c0_7] : memref<128x128xbf16, #tpu.memory_space<vmem>>, vector<128x128xbf16>
    %c0_8 = arith.constant 0 : index
    %c0_9 = arith.constant 0 : index
    %10 = vector.load %arg5[%c0_8, %c0_9] : memref<1x128xf32, #tpu.memory_space<vmem>>, vector<1x128xf32>
    %cst_10 = arith.constant dense<0.000000e+00> : vector<256x128xf32>
    %11 = tpu.matmul %8, %9, %cst_10 {dimension_numbers = #tpu.dot_dimension_numbers<[1], [0], [0], [1], [0, 0, 1, 1], [], []>} : vector<256x128xbf16>, vector<128x128xbf16>, vector<256x128xf32> -> vector<256x128xf32>
    %12 = vector.broadcast %10 : vector<1x128xf32> to vector<256x128xf32>
    %13 = arith.addf %11, %12 : vector<256x128xf32>
    %c0_11 = arith.constant 0 : index
    %c0_12 = arith.constant 0 : index
    %14 = vector.load %arg6[%c0_11, %c0_12] : memref<256x128xf32, #tpu.memory_space<vmem>>, vector<256x128xf32>
    tpu.vector_store %arg6[%c0_11, %c0_12], %13 {strides = array<i32>} : memref<256x128xf32, #tpu.memory_space<vmem>>, vector<256x128xf32>,
    return
  }
  func.func @transform_0(%arg0: i32) -> (i32, i32) {
    %c0_i32 = arith.constant 0 : i32
    %c0_i32_0 = arith.constant 0 : i32
    return %arg0, %c0_i32 : i32, i32
  }
  func.func @transform_1(%arg0: i32) -> (i32, i32) {
    %c0_i32 = arith.constant 0 : i32
    %c0_i32_0 = arith.constant 0 : i32
    %c0_i32_1 = arith.constant 0 : i32
    return %c0_i32, %c0_i32_0 : i32, i32
  }
  func.func @transform_2(%arg0: i32) -> (i32, i32) {
    %c0_i32 = arith.constant 0 : i32
    %c0_i32_0 = arith.constant 0 : i32
    %c0_i32_1 = arith.constant 0 : i32
    return %c0_i32, %c0_i32_0 : i32, i32
  }
  func.func @transform_3(%arg0: i32) -> (i32, i32) {
    %c0_i32 = arith.constant 0 : i32
    %c0_i32_0 = arith.constant 0 : i32
    %c0_i32_1 = arith.constant 0 : i32
    return %c0_i32, %c0_i32_0 : i32, i32
  }
  func.func @transform_4(%arg0: i32) -> (i32, i32) {
    %c0_i32 = arith.constant 0 : i32
    %c0_i32_0 = arith.constant 0 : i32
    %c0_i32_1 = arith.constant 0 : i32
    return %c0_i32, %c0_i32_0 : i32, i32
  }
  func.func @transform_5(%arg0: i32) -> (i32, i32) {
    %c0_i32 = arith.constant 0 : i32
    %c0_i32_0 = arith.constant 0 : i32
    return %arg0, %c0_i32 : i32, i32
  }
}

</mosaic_0001>

<bundles_post_ra>
// kernel: tpu_custom_call.1
= control target key start
LH: loop header
LB: loop body
LE: loop exit
PB: predicated region body
PF: predicated region fallthrough
CT: control target
= control target key end

     0   :  { %10 = vsyncpa [#allocation3], 0  ;;  %s1241_s0 = inlined_call_operand.hbm [shape: bf16[256,128], index: 0, kind: input, shape index: {}]   ;;  %s1242_s1 = inlined_call_operand.hbm [shape: bf16[128,128], index: 1, kind: input, shape index: {}]   ;;  %s1243_s2 = inlined_call_operand.vmem [shape: f32[1,128], index: 2, kind: input, shape index: {}]   ;;  %s1244_s3 = inlined_call_operand.hbm [shape: bf16[128,128], index: 3, kind: input, shape index: {}]   ;;  %s1245_s4 = inlined_call_operand.vmem [shape: f32[1,128], index: 4, kind: input, shape index: {}]   ;;  %s1246_s5 = inlined_call_operand.hbm [shape: f32[256,128], index: 5, kind: output, shape index: {}]  }
   0x1   :  { %11 = vsyncpa [#allocation6], 0 }
   0x2   :  { %12 = vsyncpa [#allocation4], 0  ;;  %s1065_s18 = smov [#allocation5]   ;;  %s1066_s20 = smov [#allocation2]  }
   0x3   :  { %s30_s19 = sshll.u32 %s1065_s18, 4  ;;  %s18_s21 = sshll.u32 %s1066_s20, 4  ;;  %s31_s19 = int_to_ptr.vmem [resolvable:$true] %s30_s19  ;;  %s1103_s21 = int_to_ptr.vmem [resolvable:$true] %s18_s21 }
   0x4   :  { %s971_s24 = scalar_lea.hbm %s1242_s1, 1024 }
   0x5   :  { %p972_p0 = scmp.ne.s32.totalorder %s1242_s1, %s971_s24  ;;  %p975_p1 = scmp.lt.u32.totalorder %s971_s24, %s1242_s1 }
   0x7   :  { %p977_p2 = pnand %p975_p1, %p972_p0 }
   0x9   :  { %980 = shalt.err (!%p977_p2)
}
   0xa   :  { %s981_s29 = scalar_lea.vmem %s31_s19, 1024  ;;  %p986_p4 = scmp.lt.s32.totalorder %s31_s19, %s31_s19 }
   0xb   :  { %p982_p3 = scmp.ne.s32.totalorder %s31_s19, %s981_s29  ;;  %p987_p5 = scmp.lt.s32.totalorder %s981_s29, %s981_s29 }
   0xd   :  { %p988_p6 = por %p987_p5, %p986_p4 }
   0xf   :  { %p989_p7 = pnand %p988_p6, %p982_p3 }
  0x11   :  { %992 = shalt.err (!%p989_p7)
}
  0x12   :  { %s1067_s30 = smov 64   ;;  %s1068_s6 = smov 4  }
  0x13   :  { %36 = dma.hbm_to_vmem [thread:$0]  %s1242_s1, 1024, %s31_s19, [#allocation6], %s1067_s30, %s1067_s30, %s1068_s6  }
  0x14   :  { %s993_s11 = scalar_lea.hbm %s1241_s0, 2048 }
  0x15   :  { %p994_p8 = scmp.ne.s32.totalorder %s1241_s0, %s993_s11  ;;  %p997_p9 = scmp.lt.u32.totalorder %s993_s11, %s1241_s0 }
  0x17   :  { %p999_p10 = pnand %p997_p9, %p994_p8 }
  0x19   :  { %1002 = shalt.err (!%p999_p10)
}
  0x1a   :  { %s1003_s16 = scalar_lea.vmem %s1103_s21, 2048  ;;  %p1008_p12 = scmp.lt.s32.totalorder %s1103_s21, %s1103_s21 }
  0x1b   :  { %p1004_p11 = scmp.ne.s32.totalorder %s1103_s21, %s1003_s16  ;;  %p1009_p13 = scmp.lt.s32.totalorder %s1003_s16, %s1003_s16 }
  0x1d   :  { %p1010_p0 = por %p1009_p13, %p1008_p12 }
  0x1f   :  { %p1011_p1 = pnand %p1010_p0, %p1004_p11 }
  0x21   :  { %1014 = shalt.err (!%p1011_p1)
}
  0x22   :  { %24 = dma.hbm_to_vmem [thread:$0]  %s1241_s0, 2048, %s1103_s21, [#allocation3], %s1067_s30, %s1067_s30, %s1068_s6  }
  0x23   :  { %s1069_s18 = smov [#allocation7]   ;;  %s1015_s23 = scalar_lea.hbm %s1244_s3, 1024 }
  0x24   :  { %s44_s19 = sshll.u32 %s1069_s18, 4  ;;  %p1016_p2 = scmp.ne.s32.totalorder %s1244_s3, %s1015_s23  ;;  %s45_s19 = int_to_ptr.vmem [resolvable:$true] %s44_s19 }
  0x25   :  { %p1019_p3 = scmp.lt.u32.totalorder %s1015_s23, %s1244_s3 }
  0x27   :  { %p1021_p4 = pnand %p1019_p3, %p1016_p2 }
  0x29   :  { %1024 = shalt.err (!%p1021_p4)
}
  0x2a   :  { %s1025_s28 = scalar_lea.vmem %s45_s19, 1024  ;;  %p1030_p6 = scmp.lt.s32.totalorder %s45_s19, %s45_s19 }
  0x2b   :  { %p1026_p5 = scmp.ne.s32.totalorder %s45_s19, %s1025_s28  ;;  %p1031_p7 = scmp.lt.s32.totalorder %s1025_s28, %s1025_s28 }
  0x2d   :  { %p1032_p8 = por %p1031_p7, %p1030_p6 }
  0x2f   :  { %p1033_p9 = pnand %p1032_p8, %p1026_p5 }
  0x31   :  { %1036 = shalt.err (!%p1033_p9)
}
  0x32   :  { %50 = dma.hbm_to_vmem [thread:$0]  %s1244_s3, 1024, %s45_s19, [#allocation6], %s1067_s30, %s1067_s30, %s1068_s6  }
  0x33   :  { %1059 = dma.done.wait [#allocation3], 2048  }
  0x34   :  { %1060 = vsyncadd [#allocation3], 4294965248 }
  0x35   :  { %1061 = dma.done.wait [#allocation6], 2048  }
  0x36   :  { %1062 = vsyncadd [#allocation6], 4294965248  ;;  %v939_v0 = vld [vmem:[#allocation5] sm:$0xff]   ;;  %v940_v1 = vld [vmem:[#allocation5 + $0x8] sm:$0xff]  }
  0x37   :  { %835 = vmatprep.subr.bf16.mxu0 %v939_v0  ;;  %v941_v2 = vld [vmem:[#allocation5 + $0x10] sm:$0xff]   ;;  %v942_v3 = vld [vmem:[#allocation5 + $0x18] sm:$0xff]   ;;  %v947_v4 = vld [vmem:[#allocation2] sm:$0xff]  }
  0x38   :  { %836 = vmatpush3.bf16.msra.mxu0 %v939_v0  ;;  %851 = vmatprep.mubr.bf16.mxu0 %v947_v4  ;;  %v943_v5 = vld [vmem:[#allocation5 + $0x20] sm:$0xff]   ;;  %v944_v6 = vld [vmem:[#allocation5 + $0x28] sm:$0xff]   ;;  %v945_v7 = vld [vmem:[#allocation5 + $0x30] sm:$0xff]  }
  0x39   :  { %837 = vmatprep.subr.bf16.mxu0 %v940_v1  ;;  %v946_v8 = vld [vmem:[#allocation5 + $0x38] sm:$0xff]   ;;  %v963_v9 = vld [vmem:[#allocation7] sm:$0xff]   ;;  %v964_v10 = vld [vmem:[#allocation7 + $0x8] sm:$0xff]  }
  0x3a   :  { %883 = vmatprep.subr.bf16.mxu1 %v963_v9  ;;  %v965_v11 = vld [vmem:[#allocation7 + $0x10] sm:$0xff]   ;;  %v948_v12 = vld [vmem:[#allocation2 + $0x8] sm:$0xff]   ;;  %v966_v14 = vld [vmem:[#allocation7 + $0x18] sm:$0xff]  }
  0x3b   :  { %884 = vmatpush3.bf16.msra.mxu1 %v963_v9  ;;  %v949_v13 = vld [vmem:[#allocation2 + $0x10] sm:$0xff]   ;;  %v967_v15 = vld [vmem:[#allocation7 + $0x20] sm:$0xff]   ;;  %v950_v16 = vld [vmem:[#allocation2 + $0x18] sm:$0xff]  }
  0x3c   :  { %838 = vmatpush3.bf16.msra.mxu0 %v940_v1  ;;  %885 = vmatprep.subr.bf16.mxu1 %v964_v10  ;;  %v951_v17 = vld [vmem:[#allocation2 + $0x20] sm:$0xff]   ;;  %v968_v18 = vld [vmem:[#allocation7 + $0x28] sm:$0xff]   ;;  %v953_v20 = vld [vmem:[#allocation2 + $0x30] sm:$0xff]  }
  0x3d   :  { %839 = vmatprep.subr.bf16.mxu0 %v941_v2  ;;  %v952_v19 = vld [vmem:[#allocation2 + $0x28] sm:$0xff]   ;;  %v954_v21 = vld [vmem:[#allocation2 + $0x38] sm:$0xff]   ;;  %v955_v22 = vld [vmem:[#allocation2 + $0x40] sm:$0xff]  }
  0x3e   :  { %v956_v23 = vld [vmem:[#allocation2 + $0x48] sm:$0xff]   ;;  %v957_v24 = vld [vmem:[#allocation2 + $0x50] sm:$0xff]   ;;  %v958_v25 = vld [vmem:[#allocation2 + $0x58] sm:$0xff]  }
  0x3f   :  { %886 = vmatpush3.bf16.msra.mxu1 %v964_v10  ;;  %v959_v26 = vld [vmem:[#allocation2 + $0x60] sm:$0xff]   ;;  %v960_v27 = vld [vmem:[#allocation2 + $0x68] sm:$0xff]   ;;  %v961_v28 = vld [vmem:[#allocation2 + $0x70] sm:$0xff]  }
  0x40   :  { %840 = vmatpush3.bf16.msra.mxu0 %v941_v2  ;;  %887 = vmatprep.subr.bf16.mxu1 %v965_v11  ;;  %v962_v29 = vld [vmem:[#allocation2 + $0x78] sm:$0xff]   ;;  %v969_v30 = vld [vmem:[#allocation7 + $0x30] sm:$0xff]   ;;  %v1158_v32 = vld [vmem:[%s1243_s2] ss:$0 sm:$0xff] }
  0x41   :  { %841 = vmatprep.subr.bf16.mxu0 %v942_v3  ;;  %v970_v31 = vld [vmem:[#allocation7 + $0x38] sm:$0xff]  }
  0x43   :  { %888 = vmatpush3.bf16.msra.mxu1 %v965_v11 }
  0x44   :  { %842 = vmatpush3.bf16.msra.mxu0 %v942_v3  ;;  %889 = vmatprep.subr.bf16.mxu1 %v966_v14 }
  0x45   :  { %843 = vmatprep.subr.bf16.mxu0 %v943_v5 }
  0x47   :  { %890 = vmatpush3.bf16.msra.mxu1 %v966_v14 }
  0x48   :  { %844 = vmatpush3.bf16.msra.mxu0 %v943_v5  ;;  %891 = vmatprep.subr.bf16.mxu1 %v967_v15 }
  0x49   :  { %845 = vmatprep.subr.bf16.mxu0 %v944_v6 }
  0x4b   :  { %892 = vmatpush3.bf16.msra.mxu1 %v967_v15 }
  0x4c   :  { %846 = vmatpush3.bf16.msra.mxu0 %v944_v6  ;;  %893 = vmatprep.subr.bf16.mxu1 %v968_v18 }
  0x4d   :  { %847 = vmatprep.subr.bf16.mxu0 %v945_v7 }
  0x4f   :  { %894 = vmatpush3.bf16.msra.mxu1 %v968_v18 }
  0x50   :  { %848 = vmatpush3.bf16.msra.mxu0 %v945_v7  ;;  %895 = vmatprep.subr.bf16.mxu1 %v969_v30 }
  0x51   :  { %849 = vmatprep.subr.bf16.mxu0 %v946_v8 }
  0x53   :  { %896 = vmatpush3.bf16.msra.mxu1 %v969_v30 }
  0x54   :  { %850 = vmatpush3.bf16.msra.mxu0 %v946_v8  ;;  %897 = vmatprep.subr.bf16.mxu1 %v970_v31 }
  0x57   :  { %852 = vmatmul.mubr.bf16.vlgmr.msra.gmra.mrb[0].mxu0 %v948_v12  ;;  %898 = vmatpush3.bf16.msra.mxu1 %v970_v31 }
  0x58   :  { %855 = vmatprep.mubr.bf16.mxu0 %v949_v13 }
  0x5f   :  { %856 = vmatmul.mubr.bf16.gmra.mrb[4].mxu0 %v950_v16 }
  0x60   :  { %859 = vmatprep.mubr.bf16.mxu0 %v951_v17 }
  0x67   :  { %860 = vmatmul.mubr.bf16.gmra.mrb[8].mxu0 %v952_v19 }
  0x68   :  { %863 = vmatprep.mubr.bf16.mxu0 %v953_v20 }
  0x6f   :  { %864 = vmatmul.mubr.bf16.gmra.mrb[12].mxu0 %v954_v21 }
  0x70   :  { %867 = vmatprep.mubr.bf16.mxu0 %v955_v22 }
  0x77   :  { %868 = vmatmul.mubr.bf16.gmra.mrb[16].mxu0 %v956_v23 }
  0x78   :  { %871 = vmatprep.mubr.bf16.mxu0 %v957_v24 }
  0x7f   :  { %872 = vmatmul.mubr.bf16.gmra.mrb[20].mxu0 %v958_v25 }
  0x80   :  { %875 = vmatprep.mubr.bf16.mxu0 %v959_v26 }
  0x87   :  { %876 = vmatmul.mubr.bf16.gmra.mrb[24].mxu0 %v960_v27 }
  0x88   :  { %879 = vmatprep.mubr.bf16.mxu0 %v961_v28 }
  0x8f   :  { %880 = vmatmul.mubr.bf16.gmra.mrb[28].mxu0 %v962_v29 }
 0x12a   :  { %v853_v33 = vpop.f32.mrb[0].mxu0 }
 0x12b   :  { %v305_v34 = vadd.f32 %v853_v33, %v1158_v32  ;;  %v296_v35 = vpop.f32.mrb[1].mxu0 }
 0x12c   :  { %v297_v36 = vadd.f32 %v1158_v32, %v296_v35  ;;  %v854_v37 = vpop.f32.mrb[2].mxu0 }
 0x12d   :  { %v308_v38 = vadd.f32 %v854_v37, %v1158_v32  ;;  %v299_v39 = vpop.f32.mrb[3].mxu0  ;;  %v425_v41 = vmax.f32 %v305_v34, 0.0 }
 0x12e   :  { %v300_v40 = vadd.f32 %v1158_v32, %v299_v39  ;;  %v423_v43 = vmax.f32 %v297_v36, 0.0 }
 0x12f   :  { %v426_v42 = vmax.f32 %v308_v38, 0.0 }
 0x130   :  { %v424_v44 = vmax.f32 %v300_v40, 0.0 }
 0x131   :  { %v456_v45 = vpack.c.bf16 %v426_v42, %v425_v41 }
 0x132   :  { %v857_v46 = vpop.f32.mrb[4].mxu0  ;;  %v455_v47 = vpack.c.bf16 %v424_v44, %v423_v43 }
 0x133   :  { %v321_v48 = vadd.f32 %v857_v46, %v1158_v32  ;;  %v312_v49 = vpop.f32.mrb[5].mxu0 }
 0x134   :  { %v313_v50 = vadd.f32 %v1158_v32, %v312_v49  ;;  %v858_v51 = vpop.f32.mrb[6].mxu0  ;;  %899 = vmatprep.mubr.bf16.mxu1 %v455_v47 }
 0x135   :  { %v324_v52 = vadd.f32 %v858_v51, %v1158_v32  ;;  %v315_v53 = vpop.f32.mrb[7].mxu0  ;;  %900 = vmatmul.mubr.bf16.vlgmr.msra.gmra.mrb[0].mxu1 %v456_v45  ;;  %v429_v55 = vmax.f32 %v321_v48, 0.0 }
 0x136   :  { %v316_v54 = vadd.f32 %v1158_v32, %v315_v53  ;;  %v427_v57 = vmax.f32 %v313_v50, 0.0 }
 0x137   :  { %v430_v56 = vmax.f32 %v324_v52, 0.0 }
 0x138   :  { %v428_v58 = vmax.f32 %v316_v54, 0.0 }
 0x139   :  { %v458_v59 = vpack.c.bf16 %v430_v56, %v429_v55 }
 0x13a   :  { %v457_v60 = vpack.c.bf16 %v428_v58, %v427_v57  ;;  %v861_v61 = vpop.f32.mrb[8].mxu0 }
 0x13b   :  { %v337_v62 = vadd.f32 %v861_v61, %v1158_v32  ;;  %v328_v63 = vpop.f32.mrb[9].mxu0 }
 0x13c   :  { %v329_v0 = vadd.f32 %v1158_v32, %v328_v63  ;;  %v862_v1 = vpop.f32.mrb[10].mxu0  ;;  %903 = vmatprep.mubr.bf16.mxu1 %v457_v60 }
 0x13d   :  { %v340_v2 = vadd.f32 %v862_v1, %v1158_v32  ;;  %v331_v3 = vpop.f32.mrb[11].mxu0  ;;  %904 = vmatmul.mubr.bf16.gmra.mrb[4].mxu1 %v458_v59  ;;  %v433_v5 = vmax.f32 %v337_v62, 0.0 }
 0x13e   :  { %v332_v4 = vadd.f32 %v1158_v32, %v331_v3  ;;  %v431_v7 = vmax.f32 %v329_v0, 0.0 }
 0x13f   :  { %v434_v6 = vmax.f32 %v340_v2, 0.0 }
 0x140   :  { %v432_v8 = vmax.f32 %v332_v4, 0.0 }
 0x141   :  { %v460_v9 = vpack.c.bf16 %v434_v6, %v433_v5 }
 0x142   :  { %v459_v10 = vpack.c.bf16 %v432_v8, %v431_v7  ;;  %v865_v11 = vpop.f32.mrb[12].mxu0 }
 0x143   :  { %v353_v12 = vadd.f32 %v865_v11, %v1158_v32  ;;  %v344_v13 = vpop.f32.mrb[13].mxu0 }
 0x144   :  { %v345_v14 = vadd.f32 %v1158_v32, %v344_v13  ;;  %v866_v15 = vpop.f32.mrb[14].mxu0  ;;  %907 = vmatprep.mubr.bf16.mxu1 %v459_v10 }
 0x145   :  { %v356_v16 = vadd.f32 %v866_v15, %v1158_v32  ;;  %v347_v17 = vpop.f32.mrb[15].mxu0  ;;  %908 = vmatmul.mubr.bf16.gmra.mrb[8].mxu1 %v460_v9  ;;  %v437_v19 = vmax.f32 %v353_v12, 0.0 }
 0x146   :  { %v348_v18 = vadd.f32 %v1158_v32, %v347_v17  ;;  %v435_v21 = vmax.f32 %v345_v14, 0.0 }
 0x147   :  { %v438_v20 = vmax.f32 %v356_v16, 0.0 }
 0x148   :  { %v436_v22 = vmax.f32 %v348_v18, 0.0  ;;  %v1195_v18 = vld [vmem:[%s1245_s4] ss:$0 sm:$0xff]  ;;  %s1070_s4 = smov [#allocation8]  }
 0x149   :  { %v462_v23 = vpack.c.bf16 %v438_v20, %v437_v19  ;;  %s740_s6 = sshll.u32 %s1070_s4, 4  ;;  %s741_s6 = int_to_ptr.vmem [resolvable:$true] %s740_s6 }
 0x14a   :  { %v461_v24 = vpack.c.bf16 %v436_v22, %v435_v21  ;;  %v869_v25 = vpop.f32.mrb[16].mxu0  ;;  %s1037_s7 = scalar_lea.vmem %s741_s6, 4096  ;;  %p1042_p11 = scmp.lt.s32.totalorder %s741_s6, %s741_s6 }
 0x14b   :  { %v369_v26 = vadd.f32 %v869_v25, %v1158_v32  ;;  %v360_v27 = vpop.f32.mrb[17].mxu0  ;;  %p1038_p10 = scmp.ne.s32.totalorder %s741_s6, %s1037_s7  ;;  %p1043_p12 = scmp.lt.s32.totalorder %s1037_s7, %s1037_s7 }
 0x14c   :  { %v361_v28 = vadd.f32 %v1158_v32, %v360_v27  ;;  %v870_v29 = vpop.f32.mrb[18].mxu0  ;;  %911 = vmatprep.mubr.bf16.mxu1 %v461_v24 }
 0x14d   :  { %v372_v30 = vadd.f32 %v870_v29, %v1158_v32  ;;  %v363_v31 = vpop.f32.mrb[19].mxu0  ;;  %912 = vmatmul.mubr.bf16.gmra.mrb[12].mxu1 %v462_v23  ;;  %v441_v34 = vmax.f32 %v369_v26, 0.0  ;;  %p1044_p13 = por %p1043_p12, %p1042_p11 }
 0x14e   :  { %v364_v33 = vadd.f32 %v1158_v32, %v363_v31  ;;  %v439_v36 = vmax.f32 %v361_v28, 0.0 }
 0x14f   :  { %v442_v35 = vmax.f32 %v372_v30, 0.0  ;;  %p1045_p0 = pnand %p1044_p13, %p1038_p10 }
 0x150   :  { %v440_v37 = vmax.f32 %v364_v33, 0.0 }
 0x151   :  { %v464_v38 = vpack.c.bf16 %v442_v35, %v441_v34 }
 0x152   :  { %v463_v39 = vpack.c.bf16 %v440_v37, %v439_v36  ;;  %v873_v40 = vpop.f32.mrb[20].mxu0 }
 0x153   :  { %v385_v41 = vadd.f32 %v873_v40, %v1158_v32  ;;  %v376_v42 = vpop.f32.mrb[21].mxu0 }
 0x154   :  { %v377_v43 = vadd.f32 %v1158_v32, %v376_v42  ;;  %v874_v44 = vpop.f32.mrb[22].mxu0  ;;  %915 = vmatprep.mubr.bf16.mxu1 %v463_v39 }
 0x155   :  { %v388_v45 = vadd.f32 %v874_v44, %v1158_v32  ;;  %v379_v46 = vpop.f32.mrb[23].mxu0  ;;  %916 = vmatmul.mubr.bf16.gmra.mrb[16].mxu1 %v464_v38  ;;  %v445_v48 = vmax.f32 %v385_v41, 0.0 }
 0x156   :  { %v380_v47 = vadd.f32 %v1158_v32, %v379_v46  ;;  %v443_v50 = vmax.f32 %v377_v43, 0.0 }
 0x157   :  { %v446_v49 = vmax.f32 %v388_v45, 0.0 }
 0x158   :  { %v444_v51 = vmax.f32 %v380_v47, 0.0 }
 0x159   :  { %v466_v52 = vpack.c.bf16 %v446_v49, %v445_v48 }
 0x15a   :  { %v465_v53 = vpack.c.bf16 %v444_v51, %v443_v50  ;;  %v877_v54 = vpop.f32.mrb[24].mxu0 }
 0x15b   :  { %v401_v55 = vadd.f32 %v877_v54, %v1158_v32  ;;  %v392_v56 = vpop.f32.mrb[25].mxu0 }
 0x15c   :  { %v393_v57 = vadd.f32 %v1158_v32, %v392_v56  ;;  %v878_v58 = vpop.f32.mrb[26].mxu0  ;;  %919 = vmatprep.mubr.bf16.mxu1 %v465_v53 }
 0x15d   :  { %v404_v59 = vadd.f32 %v878_v58, %v1158_v32  ;;  %v395_v60 = vpop.f32.mrb[27].mxu0  ;;  %920 = vmatmul.mubr.bf16.gmra.mrb[20].mxu1 %v466_v52  ;;  %v449_v62 = vmax.f32 %v401_v55, 0.0 }
 0x15e   :  { %v396_v61 = vadd.f32 %v1158_v32, %v395_v60  ;;  %v447_v0 = vmax.f32 %v393_v57, 0.0 }
 0x15f   :  { %v450_v63 = vmax.f32 %v404_v59, 0.0 }
 0x160   :  { %v448_v1 = vmax.f32 %v396_v61, 0.0 }
 0x161   :  { %v468_v2 = vpack.c.bf16 %v450_v63, %v449_v62 }
 0x162   :  { %v467_v3 = vpack.c.bf16 %v448_v1, %v447_v0  ;;  %v881_v4 = vpop.f32.mrb[28].mxu0 }
 0x163   :  { %v417_v5 = vadd.f32 %v881_v4, %v1158_v32  ;;  %v408_v6 = vpop.f32.mrb[29].mxu0 }
 0x164   :  { %v409_v7 = vadd.f32 %v1158_v32, %v408_v6  ;;  %v882_v8 = vpop.f32.mrb[30].mxu0  ;;  %923 = vmatprep.mubr.bf16.mxu1 %v467_v3 }
 0x165   :  { %v420_v9 = vadd.f32 %v882_v8, %v1158_v32  ;;  %v411_v10 = vpop.f32.mrb[31].mxu0  ;;  %924 = vmatmul.mubr.bf16.gmra.mrb[24].mxu1 %v468_v2  ;;  %v453_v12 = vmax.f32 %v417_v5, 0.0 }
 0x166   :  { %v412_v11 = vadd.f32 %v1158_v32, %v411_v10  ;;  %v451_v14 = vmax.f32 %v409_v7, 0.0 }
 0x167   :  { %v454_v13 = vmax.f32 %v420_v9, 0.0 }
 0x168   :  { %v452_v15 = vmax.f32 %v412_v11, 0.0 }
 0x169   :  { %v470_v16 = vpack.c.bf16 %v454_v13, %v453_v12 }
 0x16a   :  { %v469_v17 = vpack.c.bf16 %v452_v15, %v451_v14 }
 0x16c   :  { %927 = vmatprep.mubr.bf16.mxu1 %v469_v17 }
 0x16d   :  { %928 = vmatmul.mubr.bf16.gmra.mrb[28].mxu1 %v470_v16 }
 0x208   :  { %v901_v19 = vpop.f32.mrb[0].mxu1 }
 0x209   :  { %v585_v20 = vadd.f32 %v901_v19, %v1195_v18  ;;  %v576_v21 = vpop.f32.mrb[1].mxu1 }
 0x20a   :  { %v577_v22 = vadd.f32 %v1195_v18, %v576_v21  ;;  %v902_v32 = vpop.f32.mrb[2].mxu1 }
 0x20b   :  { %705 = vst [vmem:[#allocation8 + $0x10] sm:$0xff] %v585_v20  ;;  %v588_v23 = vadd.f32 %v902_v32, %v1195_v18  ;;  %v579_v24 = vpop.f32.mrb[3].mxu1 }
 0x20c   :  { %703 = vst [vmem:[#allocation8] sm:$0xff] %v577_v22  ;;  %v580_v25 = vadd.f32 %v1195_v18, %v579_v24 }
 0x20d   :  { %706 = vst [vmem:[#allocation8 + $0x18] sm:$0xff] %v588_v23 }
 0x20e   :  { %704 = vst [vmem:[#allocation8 + $0x8] sm:$0xff] %v580_v25 }
 0x210   :  { %v905_v26 = vpop.f32.mrb[4].mxu1 }
 0x211   :  { %v601_v27 = vadd.f32 %v905_v26, %v1195_v18  ;;  %v592_v28 = vpop.f32.mrb[5].mxu1 }
 0x212   :  { %v593_v29 = vadd.f32 %v1195_v18, %v592_v28  ;;  %v906_v30 = vpop.f32.mrb[6].mxu1 }
 0x213   :  { %709 = vst [vmem:[#allocation8 + $0x30] sm:$0xff] %v601_v27  ;;  %v604_v31 = vadd.f32 %v906_v30, %v1195_v18  ;;  %v595_v33 = vpop.f32.mrb[7].mxu1 }
 0x214   :  { %707 = vst [vmem:[#allocation8 + $0x20] sm:$0xff] %v593_v29  ;;  %v596_v34 = vadd.f32 %v1195_v18, %v595_v33 }
 0x215   :  { %710 = vst [vmem:[#allocation8 + $0x38] sm:$0xff] %v604_v31 }
 0x216   :  { %708 = vst [vmem:[#allocation8 + $0x28] sm:$0xff] %v596_v34 }
 0x218   :  { %v909_v35 = vpop.f32.mrb[8].mxu1 }
 0x219   :  { %v617_v36 = vadd.f32 %v909_v35, %v1195_v18  ;;  %v608_v37 = vpop.f32.mrb[9].mxu1 }
 0x21a   :  { %v609_v38 = vadd.f32 %v1195_v18, %v608_v37  ;;  %v910_v39 = vpop.f32.mrb[10].mxu1 }
 0x21b   :  { %713 = vst [vmem:[#allocation8 + $0x50] sm:$0xff] %v617_v36  ;;  %v620_v40 = vadd.f32 %v910_v39, %v1195_v18  ;;  %v611_v41 = vpop.f32.mrb[11].mxu1 }
 0x21c   :  { %711 = vst [vmem:[#allocation8 + $0x40] sm:$0xff] %v609_v38  ;;  %v612_v42 = vadd.f32 %v1195_v18, %v611_v41 }
 0x21d   :  { %714 = vst [vmem:[#allocation8 + $0x58] sm:$0xff] %v620_v40 }
 0x21e   :  { %712 = vst [vmem:[#allocation8 + $0x48] sm:$0xff] %v612_v42 }
 0x220   :  { %v913_v43 = vpop.f32.mrb[12].mxu1 }
 0x221   :  { %v633_v44 = vadd.f32 %v913_v43, %v1195_v18  ;;  %v624_v45 = vpop.f32.mrb[13].mxu1 }
 0x222   :  { %v625_v46 = vadd.f32 %v1195_v18, %v624_v45  ;;  %v914_v47 = vpop.f32.mrb[14].mxu1 }
 0x223   :  { %717 = vst [vmem:[#allocation8 + $0x70] sm:$0xff] %v633_v44  ;;  %v636_v48 = vadd.f32 %v914_v47, %v1195_v18  ;;  %v627_v49 = vpop.f32.mrb[15].mxu1 }
 0x224   :  { %715 = vst [vmem:[#allocation8 + $0x60] sm:$0xff] %v625_v46  ;;  %v628_v50 = vadd.f32 %v1195_v18, %v627_v49 }
 0x225   :  { %718 = vst [vmem:[#allocation8 + $0x78] sm:$0xff] %v636_v48 }
 0x226   :  { %716 = vst [vmem:[#allocation8 + $0x68] sm:$0xff] %v628_v50 }
 0x228   :  { %v917_v51 = vpop.f32.mrb[16].mxu1 }
 0x229   :  { %v649_v52 = vadd.f32 %v917_v51, %v1195_v18  ;;  %v640_v53 = vpop.f32.mrb[17].mxu1 }
 0x22a   :  { %v641_v54 = vadd.f32 %v1195_v18, %v640_v53  ;;  %v918_v55 = vpop.f32.mrb[18].mxu1 }
 0x22b   :  { %721 = vst [vmem:[#allocation8 + $0x90] sm:$0xff] %v649_v52  ;;  %v652_v56 = vadd.f32 %v918_v55, %v1195_v18  ;;  %v643_v57 = vpop.f32.mrb[19].mxu1 }
 0x22c   :  { %719 = vst [vmem:[#allocation8 + $0x80] sm:$0xff] %v641_v54  ;;  %v644_v58 = vadd.f32 %v1195_v18, %v643_v57 }
 0x22d   :  { %722 = vst [vmem:[#allocation8 + $0x98] sm:$0xff] %v652_v56 }
 0x22e   :  { %720 = vst [vmem:[#allocation8 + $0x88] sm:$0xff] %v644_v58 }
 0x230   :  { %v921_v59 = vpop.f32.mrb[20].mxu1 }
 0x231   :  { %v665_v60 = vadd.f32 %v921_v59, %v1195_v18  ;;  %v656_v61 = vpop.f32.mrb[21].mxu1 }
 0x232   :  { %v657_v62 = vadd.f32 %v1195_v18, %v656_v61  ;;  %v922_v63 = vpop.f32.mrb[22].mxu1 }
 0x233   :  { %725 = vst [vmem:[#allocation8 + $0xb0] sm:$0xff] %v665_v60  ;;  %v668_v0 = vadd.f32 %v922_v63, %v1195_v18  ;;  %v659_v1 = vpop.f32.mrb[23].mxu1 }
 0x234   :  { %723 = vst [vmem:[#allocation8 + $0xa0] sm:$0xff] %v657_v62  ;;  %v660_v2 = vadd.f32 %v1195_v18, %v659_v1 }
 0x235   :  { %726 = vst [vmem:[#allocation8 + $0xb8] sm:$0xff] %v668_v0 }
 0x236   :  { %724 = vst [vmem:[#allocation8 + $0xa8] sm:$0xff] %v660_v2 }
 0x238   :  { %v925_v3 = vpop.f32.mrb[24].mxu1 }
 0x239   :  { %v681_v4 = vadd.f32 %v925_v3, %v1195_v18  ;;  %v672_v5 = vpop.f32.mrb[25].mxu1 }
 0x23a   :  { %v673_v6 = vadd.f32 %v1195_v18, %v672_v5  ;;  %v926_v7 = vpop.f32.mrb[26].mxu1 }
 0x23b   :  { %729 = vst [vmem:[#allocation8 + $0xd0] sm:$0xff] %v681_v4  ;;  %v684_v8 = vadd.f32 %v926_v7, %v1195_v18  ;;  %v675_v9 = vpop.f32.mrb[27].mxu1 }
 0x23c   :  { %727 = vst [vmem:[#allocation8 + $0xc0] sm:$0xff] %v673_v6  ;;  %v676_v10 = vadd.f32 %v1195_v18, %v675_v9 }
 0x23d   :  { %730 = vst [vmem:[#allocation8 + $0xd8] sm:$0xff] %v684_v8 }
 0x23e   :  { %728 = vst [vmem:[#allocation8 + $0xc8] sm:$0xff] %v676_v10 }
 0x240   :  { %v929_v11 = vpop.f32.mrb[28].mxu1 }
 0x241   :  { %v697_v12 = vadd.f32 %v929_v11, %v1195_v18  ;;  %v688_v13 = vpop.f32.mrb[29].mxu1 }
 0x242   :  { %v689_v14 = vadd.f32 %v1195_v18, %v688_v13  ;;  %v930_v15 = vpop.f32.mrb[30].mxu1 }
 0x243   :  { %733 = vst [vmem:[#allocation8 + $0xf0] sm:$0xff] %v697_v12  ;;  %v700_v16 = vadd.f32 %v930_v15, %v1195_v18  ;;  %v691_v17 = vpop.f32.mrb[31].mxu1 }
 0x244   :  { %731 = vst [vmem:[#allocation8 + $0xe0] sm:$0xff] %v689_v14  ;;  %v692_v19 = vadd.f32 %v1195_v18, %v691_v17 }
 0x245   :  { %734 = vst [vmem:[#allocation8 + $0xf8] sm:$0xff] %v700_v16 }
 0x246   :  { %732 = vst [vmem:[#allocation8 + $0xe8] sm:$0xff] %v692_v19 }
 0x247   :  { %1048 = shalt.err (!%p1045_p0)
}
 0x248   :  { %s1049_s10 = scalar_lea.hbm %s1246_s5, 4096 }
 0x249   :  { %p1050_p1 = scmp.ne.s32.totalorder %s1246_s5, %s1049_s10  ;;  %p1053_p2 = scmp.lt.u32.totalorder %s1049_s10, %s1246_s5 }
 0x24b   :  { %p1055_p3 = pnand %p1053_p2, %p1050_p1 }
 0x24d   :  { %1058 = shalt.err (!%p1055_p3)
}
 0x24e   :  { %s1071_s15 = smov 128   ;;  %s1072_s16 = smov 8  }
 0x24f   :  { %746 = dma.vmem_to_hbm [thread:$0]  %s741_s6, 4096, %s1246_s5, [#allocation4], %s1071_s15, %s1071_s15, %s1072_s16  }
 0x250   :  { %1063 = dma.done.wait [#allocation4], 4096  }
 0x251   :  { %1064 = vsyncadd [#allocation4], 4294963200 }
 0x252   :  { %750 = vsyncpa [#allocation3], 1 }
 0x253   :  { %751 = vsyncpa [#allocation6], 1 }
 0x254   :  { %752 = vsyncpa [#allocation4], 1 }

</bundles_post_ra>
